<compile_context>
chip_gen: v6e
topology: v6e:2x2x1
jax: 0.10.0
libtpu: 0.0.40
codegen_flags: <defaults>
</compile_context>

<pallas_src>
import functools
import math

import jax
import jax.numpy as jnp
from jax.experimental import pallas as pl
from jax.experimental.pallas import tpu as pltpu


def _round_up(x: int, m: int) -> int:
    return (x + m - 1) // m * m


def _cdiv(a: int, b: int) -> int:
    return (a + b - 1) // b


def _mlp_fused_kernel(x_ref, *refs, num_layers: int):
    """Fused MLP on one (TM, in_dim) row-tile.

    refs = (w0, b0, w1, b1, ..., w_{L-1}, b_{L-1}, o_ref)
    Weights bf16, biases f32; intermediates are f32 (accumulation) and re-cast
    to bf16 for the next MXU matmul.
    """
    o_ref = refs[-1]
    wb = refs[:-1]

    h = x_ref[...]                                  # bf16 (TM, K0)
    for li in range(num_layers):
        w = wb[2 * li][...]                         # bf16 (K, N)
        b = wb[2 * li + 1][...]                     # f32  (1, N)
        y = jnp.dot(h, w, preferred_element_type=jnp.float32) + b
        if li < num_layers - 1:
            h = jnp.maximum(y, 0.0).astype(jnp.bfloat16)
        else:
            o_ref[...] = y.astype(o_ref.dtype)


def prepare_mlp_params(params, input_dim):
    """One-time preparation: zero-pad hidden dims to 128 lanes, cast W to bf16.

    params: list of (W(in, out) f32, b(1, out) f32), PyTorch nn.Linear layout
            transposed so the kernel computes y = x @ W + b.
    The input dim is left unpadded (x is fed natively); the output dim is
    padded only when it is large and unaligned.
    """
    num_layers = len(params)
    out_dim = params[-1][0].shape[1]

    dims = [input_dim] + [w.shape[1] for (w, _) in params]
    dims_pad = [input_dim]
    for li in range(1, num_layers + 1):
        d = dims[li]
        if li < num_layers:
            dims_pad.append(_round_up(d, 128))          # hidden: lane-dense
        else:
            pad_out = (d % 128 == 0) or (d >= 512)      # output: only if large
            dims_pad.append(_round_up(d, 128) if pad_out else d)

    flat_wb = []
    for li, (w, b) in enumerate(params):
        kp, np_ = dims_pad[li], dims_pad[li + 1]
        if (kp, np_) == tuple(w.shape):
            wp = w.astype(jnp.bfloat16)
        else:
            wp = jnp.zeros((kp, np_), jnp.bfloat16)
            wp = wp.at[: w.shape[0], : w.shape[1]].set(w.astype(jnp.bfloat16))
        b2 = b.reshape(1, -1)
        if np_ == b2.shape[1]:
            bp = b2.astype(jnp.float32)
        else:
            bp = jnp.zeros((1, np_), jnp.float32)
            bp = bp.at[:, : b2.shape[1]].set(b2.astype(jnp.float32))
        flat_wb += [wp, bp]

    return {
        "flat_wb": tuple(flat_wb),
        "dims_pad": tuple(dims_pad),
        "in_dim": int(input_dim),
        "out_dim": int(out_dim),
        "num_layers": int(num_layers),
    }


def mlp_forward(x, prepared, *, tm_max: int = 1024):
    """x: (..., input_dim). prepared: output of prepare_mlp_params()."""
    in_dim = prepared["in_dim"]
    out_dim = prepared["out_dim"]
    dims_pad = prepared["dims_pad"]
    flat_wb = prepared["flat_wb"]
    num_layers = prepared["num_layers"]
    out_cols = dims_pad[-1]

    orig_shape = x.shape
    assert orig_shape[-1] == in_dim
    x2d = x.reshape(-1, in_dim)
    M = x2d.shape[0]

    # ---- VMEM-aware, balanced row tiling --------------------------------
    weight_bytes = sum(int(a.size) * a.dtype.itemsize for a in flat_wb)
    max_w = max(dims_pad[1:]) if num_layers > 0 else in_dim
    # x tile (bf16, double-buffered) + out tile (f32, double-buffered)
    # + live f32 intermediates, per row of TM.
    bytes_per_row = 4 * in_dim + 8 * out_cols + 8 * max_w
    try:
        vmem_cap = int(pltpu.get_tpu_info().vmem_capacity_bytes)
    except Exception:
        vmem_cap = 64 << 20
    budget = min(vmem_cap // 2, 48 << 20)
    fit_rows = max(16, (budget - 2 * weight_bytes) // max(bytes_per_row, 1))
    tm_cap = max(16, min(tm_max, int(fit_rows)))

    n_tiles = max(1, _cdiv(M, tm_cap))
    if M >= 128:                       # give v7x's 2 TensorCores >=1 tile each
        n_tiles = max(n_tiles, 2)
        if n_tiles % 2:
            n_tiles += 1
    TM = _round_up(_cdiv(M, n_tiles), 16)
    M_pad = _round_up(M, TM)

    # ---- input: single bf16 cast; pad rows only if needed, never lanes ---
    if M_pad == M:
        xp = x2d.astype(jnp.bfloat16)
    else:
        xp = jnp.zeros((M_pad, in_dim), jnp.bfloat16)
        xp = xp.at[:M].set(x2d.astype(jnp.bfloat16))

    grid = (M_pad // TM,)

    flops = 2 * M_pad * sum(dims_pad[i] * dims_pad[i + 1]
                            for i in range(num_layers))
    bytes_accessed = int(xp.size) * 2 + weight_bytes + M_pad * out_cols * 4
    cost = pl.CostEstimate(flops=int(flops), transcendentals=0,
                           bytes_accessed=int(bytes_accessed))

    est_vmem = (2 * (TM * in_dim * 2 + TM * out_cols * 4)
                + 2 * weight_bytes + TM * max_w * 4)
    vmem_limit = None
    if est_vmem > (30 << 20):
        vmem_limit = int(min(est_vmem * 5 // 4, vmem_cap - (4 << 20)))

    def _in_specs(buffered_weights):
        specs = [pl.BlockSpec((TM, in_dim), lambda i: (i, 0))]
        for li in range(num_layers):
            kp, np_ = dims_pad[li], dims_pad[li + 1]
            if buffered_weights:
                # Grid-invariant blocks: a single resident buffer is enough.
                specs.append(pl.BlockSpec((kp, np_), lambda i: (0, 0),
                                          pipeline_mode=pl.Buffered(1)))
                specs.append(pl.BlockSpec((1, np_), lambda i: (0, 0),
                                          pipeline_mode=pl.Buffered(1)))
            else:
                specs.append(pl.BlockSpec((kp, np_), lambda i: (0, 0)))
                specs.append(pl.BlockSpec((1, np_), lambda i: (0, 0)))
        return specs

    def _run(buffered_weights):
        cp_kwargs = dict(dimension_semantics=("parallel",))
        if vmem_limit is not None:
            cp_kwargs["vmem_limit_bytes"] = vmem_limit
        return pl.pallas_call(
            functools.partial(_mlp_fused_kernel, num_layers=num_layers),
            out_shape=jax.ShapeDtypeStruct((M_pad, out_cols), jnp.float32),
            grid=grid,
            in_specs=_in_specs(buffered_weights),
            out_specs=pl.BlockSpec((TM, out_cols), lambda i: (i, 0)),
            compiler_params=pltpu.CompilerParams(**cp_kwargs),
            cost_estimate=cost,
        )(xp, *flat_wb)

    try:
        out2d = _run(True)
    except Exception:
        # Older JAX without pipeline_mode / Buffered(1): default double-buffer.
        out2d = _run(False)

    if M_pad != M or out_cols != out_dim:
        out2d = out2d[:M, :out_dim]
    return out2d.reshape(*orig_shape[:-1], out_dim)


def init_mlp_params(key, input_dim, hidden_dim, output_dim, num_layers):
    """Deterministic init mimicking nn.Linear defaults U(-1/sqrt(fan_in), +)."""
    h = [hidden_dim] * (num_layers - 1)
    dims = list(zip([input_dim] + h, h + [output_dim]))
    params = []
    for (n_in, n_out) in dims:
        key, kw, kb = jax.random.split(key, 3)
        bound = 1.0 / math.sqrt(n_in)
        w = jax.random.uniform(kw, (n_in, n_out), jnp.float32, -bound, bound)
        b = jax.random.uniform(kb, (1, n_out), jnp.float32, -bound, bound)
        params.append((w, b))
    return params


if __name__ == "__main__":
    key = jax.random.PRNGKey(0)
    key, kx = jax.random.split(key)

    # Small shapes consistent with DETR usage: (batch, num_queries, hidden_dim)
    batch, seq = 2, 8
    input_dim, hidden_dim, output_dim, num_layers = 32, 32, 4, 3

    x = jax.random.normal(kx, (batch, seq, input_dim), jnp.float32)
    params = init_mlp_params(key, input_dim, hidden_dim, output_dim, num_layers)

    prepared = prepare_mlp_params(params, input_dim)   # one-time (hoisted) prep
    out = mlp_forward(x, prepared)
    out = jax.block_until_ready(out)

    # Reference mimicking the kernel's numerics: bf16 matmul operands with
    # f32 accumulation, bias add / ReLU in f32 (same as the MXU bf16 path).
    h = x.reshape(-1, input_dim).astype(jnp.bfloat16).astype(jnp.float32)
    for i, (w, b) in enumerate(params):
        wb = w.astype(jnp.bfloat16).astype(jnp.float32)
        y = jnp.dot(h, wb, precision=jax.lax.Precision.HIGHEST) + b
        if i < num_layers - 1:
            h = jnp.maximum(y, 0.0).astype(jnp.bfloat16).astype(jnp.float32)
        else:
            h = y
    ref = h.reshape(batch, seq, output_dim)

    assert out.shape == (batch, seq, output_dim)
    assert jnp.allclose(out, ref, atol=2e-3, rtol=2e-3), (
        float(jnp.max(jnp.abs(out - ref))))

    print("KERNEL_OK")
</pallas_src>

<mosaic_0001>
module attributes {stable_mosaic.version = 11 : i64} {
  func.func @_mlp_fused_kernel(%arg0: i32, %arg1: memref<16x32xbf16, #tpu.memory_space<vmem>>, %arg2: memref<32x128xbf16, #tpu.memory_space<vmem>>, %arg3: memref<1x128xf32, #tpu.memory_space<vmem>>, %arg4: memref<128x128xbf16, #tpu.memory_space<vmem>>, %arg5: memref<1x128xf32, #tpu.memory_space<vmem>>, %arg6: memref<128x4xbf16, #tpu.memory_space<vmem>>, %arg7: memref<1x4xf32, #tpu.memory_space<vmem>>, %arg8: memref<16x4xf32, #tpu.memory_space<vmem>>) attributes {dimension_semantics = [#tpu.dimension_semantics<parallel>], iteration_bounds = array<i64: 1>, scalar_prefetch = 0 : i64, scratch_operands = 0 : i64, tpu.core_type = #tpu.core_type<tc>, window_params = [{transform_indices = @transform_0, window_bounds = array<i64: 16, 32>}, {pipeline_mode = #tpu.pipeline_mode<synchronous>, transform_indices = @transform_1, window_bounds = array<i64: 32, 128>}, {pipeline_mode = #tpu.pipeline_mode<synchronous>, transform_indices = @transform_2, window_bounds = array<i64: 1, 128>}, {pipeline_mode = #tpu.pipeline_mode<synchronous>, transform_indices = @transform_3, window_bounds = array<i64: 128, 128>}, {pipeline_mode = #tpu.pipeline_mode<synchronous>, transform_indices = @transform_4, window_bounds = array<i64: 1, 128>}, {pipeline_mode = #tpu.pipeline_mode<synchronous>, transform_indices = @transform_5, window_bounds = array<i64: 128, 4>}, {pipeline_mode = #tpu.pipeline_mode<synchronous>, transform_indices = @transform_6, window_bounds = array<i64: 1, 4>}, {transform_indices = @transform_7, window_bounds = array<i64: 16, 4>}]} {
    %c0 = arith.constant 0 : index
    %c0_0 = arith.constant 0 : index
    %0 = vector.load %arg1[%c0, %c0_0] : memref<16x32xbf16, #tpu.memory_space<vmem>>, vector<16x32xbf16>
    %c0_1 = arith.constant 0 : index
    %c0_2 = arith.constant 0 : index
    %1 = vector.load %arg2[%c0_1, %c0_2] : memref<32x128xbf16, #tpu.memory_space<vmem>>, vector<32x128xbf16>
    %c0_3 = arith.constant 0 : index
    %c0_4 = arith.constant 0 : index
    %2 = vector.load %arg3[%c0_3, %c0_4] : memref<1x128xf32, #tpu.memory_space<vmem>>, vector<1x128xf32>
    %cst = arith.constant dense<0.000000e+00> : vector<16x128xf32>
    %3 = tpu.matmul %0, %1, %cst {dimension_numbers = #tpu.dot_dimension_numbers<[1], [0], [0], [1], [0, 0, 1, 1], [], []>} : vector<16x32xbf16>, vector<32x128xbf16>, vector<16x128xf32> -> vector<16x128xf32>
    %4 = vector.broadcast %2 : vector<1x128xf32> to vector<16x128xf32>
    %5 = arith.addf %3, %4 : vector<16x128xf32>
    %cst_5 = arith.constant 0.000000e+00 : f32
    %6 = vector.broadcast %cst_5 : f32 to vector<16x128xf32>
    %7 = arith.maximumf %5, %6 : vector<16x128xf32>
    %8 = arith.truncf %7 : vector<16x128xf32> to vector<16x128xbf16>
    %c0_6 = arith.constant 0 : index
    %c0_7 = arith.constant 0 : index
    %9 = vector.load %arg4[%c0_6, %c0_7] : memref<128x128xbf16, #tpu.memory_space<vmem>>, vector<128x128xbf16>
    %c0_8 = arith.constant 0 : index
    %c0_9 = arith.constant 0 : index
    %10 = vector.load %arg5[%c0_8, %c0_9] : memref<1x128xf32, #tpu.memory_space<vmem>>, vector<1x128xf32>
    %cst_10 = arith.constant dense<0.000000e+00> : vector<16x128xf32>
    %11 = tpu.matmul %8, %9, %cst_10 {dimension_numbers = #tpu.dot_dimension_numbers<[1], [0], [0], [1], [0, 0, 1, 1], [], []>} : vector<16x128xbf16>, vector<128x128xbf16>, vector<16x128xf32> -> vector<16x128xf32>
    %12 = vector.broadcast %10 : vector<1x128xf32> to vector<16x128xf32>
    %13 = arith.addf %11, %12 : vector<16x128xf32>
    %cst_11 = arith.constant 0.000000e+00 : f32
    %14 = vector.broadcast %cst_11 : f32 to vector<16x128xf32>
    %15 = arith.maximumf %13, %14 : vector<16x128xf32>
    %16 = arith.truncf %15 : vector<16x128xf32> to vector<16x128xbf16>
    %c0_12 = arith.constant 0 : index
    %c0_13 = arith.constant 0 : index
    %17 = vector.load %arg6[%c0_12, %c0_13] : memref<128x4xbf16, #tpu.memory_space<vmem>>, vector<128x4xbf16>
    %c0_14 = arith.constant 0 : index
    %c0_15 = arith.constant 0 : index
    %18 = vector.load %arg7[%c0_14, %c0_15] : memref<1x4xf32, #tpu.memory_space<vmem>>, vector<1x4xf32>
    %cst_16 = arith.constant dense<0.000000e+00> : vector<16x4xf32>
    %19 = tpu.matmul %16, %17, %cst_16 {dimension_numbers = #tpu.dot_dimension_numbers<[1], [0], [0], [1], [0, 0, 1, 1], [], []>} : vector<16x128xbf16>, vector<128x4xbf16>, vector<16x4xf32> -> vector<16x4xf32>
    %20 = vector.broadcast %18 : vector<1x4xf32> to vector<16x4xf32>
    %21 = arith.addf %19, %20 : vector<16x4xf32>
    %c0_17 = arith.constant 0 : index
    %c0_18 = arith.constant 0 : index
    %22 = vector.load %arg8[%c0_17, %c0_18] : memref<16x4xf32, #tpu.memory_space<vmem>>, vector<16x4xf32>
    tpu.vector_store %arg8[%c0_17, %c0_18], %21 {strides = array<i32>} : memref<16x4xf32, #tpu.memory_space<vmem>>, vector<16x4xf32>,
    return
  }
  func.func @transform_0(%arg0: i32) -> (i32, i32) {
    %c0_i32 = arith.constant 0 : i32
    %c0_i32_0 = arith.constant 0 : i32
    return %arg0, %c0_i32 : i32, i32
  }
  func.func @transform_1(%arg0: i32) -> (i32, i32) {
    %c0_i32 = arith.constant 0 : i32
    %c0_i32_0 = arith.constant 0 : i32
    %c0_i32_1 = arith.constant 0 : i32
    return %c0_i32, %c0_i32_0 : i32, i32
  }
  func.func @transform_2(%arg0: i32) -> (i32, i32) {
    %c0_i32 = arith.constant 0 : i32
    %c0_i32_0 = arith.constant 0 : i32
    %c0_i32_1 = arith.constant 0 : i32
    return %c0_i32, %c0_i32_0 : i32, i32
  }
  func.func @transform_3(%arg0: i32) -> (i32, i32) {
    %c0_i32 = arith.constant 0 : i32
    %c0_i32_0 = arith.constant 0 : i32
    %c0_i32_1 = arith.constant 0 : i32
    return %c0_i32, %c0_i32_0 : i32, i32
  }
  func.func @transform_4(%arg0: i32) -> (i32, i32) {
    %c0_i32 = arith.constant 0 : i32
    %c0_i32_0 = arith.constant 0 : i32
    %c0_i32_1 = arith.constant 0 : i32
    return %c0_i32, %c0_i32_0 : i32, i32
  }
  func.func @transform_5(%arg0: i32) -> (i32, i32) {
    %c0_i32 = arith.constant 0 : i32
    %c0_i32_0 = arith.constant 0 : i32
    %c0_i32_1 = arith.constant 0 : i32
    return %c0_i32, %c0_i32_0 : i32, i32
  }
  func.func @transform_6(%arg0: i32) -> (i32, i32) {
    %c0_i32 = arith.constant 0 : i32
    %c0_i32_0 = arith.constant 0 : i32
    %c0_i32_1 = arith.constant 0 : i32
    return %c0_i32, %c0_i32_0 : i32, i32
  }
  func.func @transform_7(%arg0: i32) -> (i32, i32) {
    %c0_i32 = arith.constant 0 : i32
    %c0_i32_0 = arith.constant 0 : i32
    return %arg0, %c0_i32 : i32, i32
  }
}

module attributes {stable_mosaic.version = 11 : i64} {
  func.func @_mlp_fused_kernel(%arg0: i32, %arg1: memref<16x32xbf16, #tpu.memory_space<vmem>>, %arg2: memref<32x128xbf16, #tpu.memory_space<vmem>>, %arg3: memref<1x128xf32, #tpu.memory_space<vmem>>, %arg4: memref<128x128xbf16, #tpu.memory_space<vmem>>, %arg5: memref<1x128xf32, #tpu.memory_space<vmem>>, %arg6: memref<128x4xbf16, #tpu.memory_space<vmem>>, %arg7: memref<1x4xf32, #tpu.memory_space<vmem>>, %arg8: memref<16x4xf32, #tpu.memory_space<vmem>>) attributes {dimension_semantics = [#tpu.dimension_semantics<parallel>], iteration_bounds = array<i64: 1>, scalar_prefetch = 0 : i64, scratch_operands = 0 : i64, tpu.core_type = #tpu.core_type<tc>, window_params = [{transform_indices = @transform_0, window_bounds = array<i64: 16, 32>}, {pipeline_mode = #tpu.pipeline_mode<synchronous>, transform_indices = @transform_1, window_bounds = array<i64: 32, 128>}, {pipeline_mode = #tpu.pipeline_mode<synchronous>, transform_indices = @transform_2, window_bounds = array<i64: 1, 128>}, {pipeline_mode = #tpu.pipeline_mode<synchronous>, transform_indices = @transform_3, window_bounds = array<i64: 128, 128>}, {pipeline_mode = #tpu.pipeline_mode<synchronous>, transform_indices = @transform_4, window_bounds = array<i64: 1, 128>}, {pipeline_mode = #tpu.pipeline_mode<synchronous>, transform_indices = @transform_5, window_bounds = array<i64: 128, 4>}, {pipeline_mode = #tpu.pipeline_mode<synchronous>, transform_indices = @transform_6, window_bounds = array<i64: 1, 4>}, {transform_indices = @transform_7, window_bounds = array<i64: 16, 4>}]} {
    %c0 = arith.constant 0 : index
    %c0_0 = arith.constant 0 : index
    %0 = vector.load %arg1[%c0, %c0_0] : memref<16x32xbf16, #tpu.memory_space<vmem>>, vector<16x32xbf16>
    %c0_1 = arith.constant 0 : index
    %c0_2 = arith.constant 0 : index
    %1 = vector.load %arg2[%c0_1, %c0_2] : memref<32x128xbf16, #tpu.memory_space<vmem>>, vector<32x128xbf16>
    %c0_3 = arith.constant 0 : index
    %c0_4 = arith.constant 0 : index
    %2 = vector.load %arg3[%c0_3, %c0_4] : memref<1x128xf32, #tpu.memory_space<vmem>>, vector<1x128xf32>
    %cst = arith.constant dense<0.000000e+00> : vector<16x128xf32>
    %3 = tpu.matmul %0, %1, %cst {dimension_numbers = #tpu.dot_dimension_numbers<[1], [0], [0], [1], [0, 0, 1, 1], [], []>} : vector<16x32xbf16>, vector<32x128xbf16>, vector<16x128xf32> -> vector<16x128xf32>
    %4 = vector.broadcast %2 : vector<1x128xf32> to vector<16x128xf32>
    %5 = arith.addf %3, %4 : vector<16x128xf32>
    %cst_5 = arith.constant 0.000000e+00 : f32
    %6 = vector.broadcast %cst_5 : f32 to vector<16x128xf32>
    %7 = arith.maximumf %5, %6 : vector<16x128xf32>
    %8 = arith.truncf %7 : vector<16x128xf32> to vector<16x128xbf16>
    %c0_6 = arith.constant 0 : index
    %c0_7 = arith.constant 0 : index
    %9 = vector.load %arg4[%c0_6, %c0_7] : memref<128x128xbf16, #tpu.memory_space<vmem>>, vector<128x128xbf16>
    %c0_8 = arith.constant 0 : index
    %c0_9 = arith.constant 0 : index
    %10 = vector.load %arg5[%c0_8, %c0_9] : memref<1x128xf32, #tpu.memory_space<vmem>>, vector<1x128xf32>
    %cst_10 = arith.constant dense<0.000000e+00> : vector<16x128xf32>
    %11 = tpu.matmul %8, %9, %cst_10 {dimension_numbers = #tpu.dot_dimension_numbers<[1], [0], [0], [1], [0, 0, 1, 1], [], []>} : vector<16x128xbf16>, vector<128x128xbf16>, vector<16x128xf32> -> vector<16x128xf32>
    %12 = vector.broadcast %10 : vector<1x128xf32> to vector<16x128xf32>
    %13 = arith.addf %11, %12 : vector<16x128xf32>
    %cst_11 = arith.constant 0.000000e+00 : f32
    %14 = vector.broadcast %cst_11 : f32 to vector<16x128xf32>
    %15 = arith.maximumf %13, %14 : vector<16x128xf32>
    %16 = arith.truncf %15 : vector<16x128xf32> to vector<16x128xbf16>
    %c0_12 = arith.constant 0 : index
    %c0_13 = arith.constant 0 : index
    %17 = vector.load %arg6[%c0_12, %c0_13] : memref<128x4xbf16, #tpu.memory_space<vmem>>, vector<128x4xbf16>
    %c0_14 = arith.constant 0 : index
    %c0_15 = arith.constant 0 : index
    %18 = vector.load %arg7[%c0_14, %c0_15] : memref<1x4xf32, #tpu.memory_space<vmem>>, vector<1x4xf32>
    %cst_16 = arith.constant dense<0.000000e+00> : vector<16x4xf32>
    %19 = tpu.matmul %16, %17, %cst_16 {dimension_numbers = #tpu.dot_dimension_numbers<[1], [0], [0], [1], [0, 0, 1, 1], [], []>} : vector<16x128xbf16>, vector<128x4xbf16>, vector<16x4xf32> -> vector<16x4xf32>
    %20 = vector.broadcast %18 : vector<1x4xf32> to vector<16x4xf32>
    %21 = arith.addf %19, %20 : vector<16x4xf32>
    %c0_17 = arith.constant 0 : index
    %c0_18 = arith.constant 0 : index
    %22 = vector.load %arg8[%c0_17, %c0_18] : memref<16x4xf32, #tpu.memory_space<vmem>>, vector<16x4xf32>
    tpu.vector_store %arg8[%c0_17, %c0_18], %21 {strides = array<i32>} : memref<16x4xf32, #tpu.memory_space<vmem>>, vector<16x4xf32>,
    return
  }
  func.func @transform_0(%arg0: i32) -> (i32, i32) {
    %c0_i32 = arith.constant 0 : i32
    %c0_i32_0 = arith.constant 0 : i32
    return %arg0, %c0_i32 : i32, i32
  }
  func.func @transform_1(%arg0: i32) -> (i32, i32) {
    %c0_i32 = arith.constant 0 : i32
    %c0_i32_0 = arith.constant 0 : i32
    %c0_i32_1 = arith.constant 0 : i32
    return %c0_i32, %c0_i32_0 : i32, i32
  }
  func.func @transform_2(%arg0: i32) -> (i32, i32) {
    %c0_i32 = arith.constant 0 : i32
    %c0_i32_0 = arith.constant 0 : i32
    %c0_i32_1 = arith.constant 0 : i32
    return %c0_i32, %c0_i32_0 : i32, i32
  }
  func.func @transform_3(%arg0: i32) -> (i32, i32) {
    %c0_i32 = arith.constant 0 : i32
    %c0_i32_0 = arith.constant 0 : i32
    %c0_i32_1 = arith.constant 0 : i32
    return %c0_i32, %c0_i32_0 : i32, i32
  }
  func.func @transform_4(%arg0: i32) -> (i32, i32) {
    %c0_i32 = arith.constant 0 : i32
    %c0_i32_0 = arith.constant 0 : i32
    %c0_i32_1 = arith.constant 0 : i32
    return %c0_i32, %c0_i32_0 : i32, i32
  }
  func.func @transform_5(%arg0: i32) -> (i32, i32) {
    %c0_i32 = arith.constant 0 : i32
    %c0_i32_0 = arith.constant 0 : i32
    %c0_i32_1 = arith.constant 0 : i32
    return %c0_i32, %c0_i32_0 : i32, i32
  }
  func.func @transform_6(%arg0: i32) -> (i32, i32) {
    %c0_i32 = arith.constant 0 : i32
    %c0_i32_0 = arith.constant 0 : i32
    %c0_i32_1 = arith.constant 0 : i32
    return %c0_i32, %c0_i32_0 : i32, i32
  }
  func.func @transform_7(%arg0: i32) -> (i32, i32) {
    %c0_i32 = arith.constant 0 : i32
    %c0_i32_0 = arith.constant 0 : i32
    return %arg0, %c0_i32 : i32, i32
  }
}

</mosaic_0001>

<bundles_post_ra>
// kernel: tpu_custom_call.1
= control target key start
LH: loop header
LB: loop body
LE: loop exit
PB: predicated region body
PF: predicated region fallthrough
CT: control target
= control target key end

     0   :  { %12 = vsyncpa [#allocation3], 0  ;;  %s669_s0 = inlined_call_operand.hbm [shape: bf16[16,32], index: 0, kind: input, shape index: {}]   ;;  %s670_s1 = inlined_call_operand.hbm [shape: bf16[32,128], index: 1, kind: input, shape index: {}]   ;;  %s671_s2 = inlined_call_operand.vmem [shape: f32[1,128], index: 2, kind: input, shape index: {}]   ;;  %s672_s3 = inlined_call_operand.vmem [shape: bf16[128,128], index: 3, kind: input, shape index: {}]   ;;  %s673_s4 = inlined_call_operand.vmem [shape: f32[1,128], index: 4, kind: input, shape index: {}]   ;;  %s674_s5 = inlined_call_operand.vmem [shape: bf16[128,4], index: 5, kind: input, shape index: {}]   ;;  %s675_s6 = inlined_call_operand.vmem [shape: f32[1,4], index: 6, kind: input, shape index: {}]   ;;  %s676_s7 = inlined_call_operand.vmem [shape: f32[16,4], index: 7, kind: output, shape index: {}]  }
   0x1   :  { %13 = vsyncpa [#allocation5], 0  ;;  %s530_s24 = smov [#allocation2]  }
   0x2   :  { %s19_s25 = sshll.u32 %s530_s24, 4  ;;  %s20_s25 = int_to_ptr.vmem [resolvable:$true] %s19_s25 }
   0x3   :  { %s494_s26 = scalar_lea.vmem %s20_s25, 128  ;;  %p499_p1 = scmp.lt.s32.totalorder %s20_s25, %s20_s25 }
   0x4   :  { %p495_p0 = scmp.ne.s32.totalorder %s20_s25, %s494_s26  ;;  %p500_p2 = scmp.lt.s32.totalorder %s494_s26, %s494_s26 }
   0x6   :  { %p501_p3 = por %p500_p2, %p499_p1 }
   0x8   :  { %p502_p4 = pnand %p501_p3, %p495_p0 }
   0xa   :  { %505 = shalt.err (!%p502_p4)
}
   0xb   :  { %s531_s27 = smov 64   ;;  %s532_s28 = smov 4  }
   0xc   :  { %25 = dma.hbm_to_vmem [thread:$0]  %s669_s0, 128, %s20_s25, [#allocation3], %s531_s27, %s531_s27, %s532_s28  }
   0xd   :  { %s533_s8 = smov [#allocation4]  }
   0xe   :  { %s31_s9 = sshll.u32 %s533_s8, 4  ;;  %s32_s9 = int_to_ptr.vmem [resolvable:$true] %s31_s9 }
   0xf   :  { %s514_s10 = scalar_lea.vmem %s32_s9, 256  ;;  %p519_p6 = scmp.lt.s32.totalorder %s32_s9, %s32_s9 }
  0x10   :  { %p515_p5 = scmp.ne.s32.totalorder %s32_s9, %s514_s10  ;;  %p520_p7 = scmp.lt.s32.totalorder %s514_s10, %s514_s10 }
  0x12   :  { %p521_p8 = por %p520_p7, %p519_p6 }
  0x14   :  { %p522_p9 = pnand %p521_p8, %p515_p5 }
  0x16   :  { %525 = shalt.err (!%p522_p9)
}
  0x17   :  { %37 = dma.hbm_to_vmem [thread:$0]  %s670_s1, 256, %s32_s9, [#allocation5], %s531_s27, %s531_s27, %s532_s28  }
  0x18   :  { %526 = dma.done.wait [#allocation3], 128  }
  0x19   :  { %527 = vsyncadd [#allocation3], 4294967168 }
  0x1a   :  { %528 = dma.done.wait [#allocation5], 256  }
  0x1b   :  { %529 = vsyncadd [#allocation5], 4294967040  ;;  %v534_v0 = vmov 0.0   ;;  %vm535_vm0 = vmmov 0   ;;  %v467_v1 = vld [vmem:[#allocation4 + $0x8] sm:$0xff]   ;;  %v468_v2 = vld [vmem:[#allocation4] sm:$0xff]  }
  0x1c   :  { %413 = vmatprep.subr.bf16.mxu0 %v534_v0  ;;  %417 = vmatprep.mubr.msk.bf16.mxu0 %vm535_vm0, %v534_v0  ;;  %v470_v3 = vld [vmem:[%s672_s3 + $0x38] sm:$0xff]   ;;  %v469_v4 = vld [vmem:[#allocation2] sm:$0xff]   ;;  %v471_v5 = vld [vmem:[%s672_s3 + $0x30] sm:$0xff]   ;;  %vm85_vm1 = vcmask 261120   ;;  %vm360_vm2 = vcmask 31744  }
  0x1d   :  { %421 = vmatprep.subr.bf16.mxu1 %v534_v0  ;;  %437 = vmatprep.mubr.msk.bf16.mxu1 %vm535_vm0, %v534_v0  ;;  %v472_v6 = vld [vmem:[%s672_s3 + $0x28] sm:$0xff]   ;;  %v473_v7 = vld [vmem:[%s672_s3 + $0x20] sm:$0xff]   ;;  %v474_v8 = vld [vmem:[%s672_s3 + $0x18] sm:$0xff]  }
  0x1e   :  { %414 = vmatpush3.bf16.msra.mxu0 %v467_v1  ;;  %422 = vmatpush3.bf16.msra.mxu1 %v470_v3  ;;  %v475_v9 = vld [vmem:[%s672_s3 + $0x10] sm:$0xff]   ;;  %v476_v10 = vld [vmem:[%s672_s3 + $0x8] sm:$0xff]   ;;  %v477_v11 = vld [vmem:[%s672_s3] sm:$0xff]  }
  0x1f   :  { %415 = vmatprep.subr.bf16.mxu0 %v534_v0  ;;  %423 = vmatprep.subr.bf16.mxu1 %v534_v0  ;;  %v478_v12 = vld [vmem:[%s674_s5 + $0x38] sm:$0xff]   ;;  %v479_v13 = vld [vmem:[%s674_s5 + $0x30] sm:$0xff]   ;;  %v480_v14 = vld [vmem:[%s674_s5 + $0x28] sm:$0xff]  }
  0x20   :  { %v481_v15 = vld [vmem:[%s674_s5 + $0x20] sm:$0xff]   ;;  %v482_v16 = vld [vmem:[%s674_s5 + $0x18] sm:$0xff]   ;;  %v483_v27 = vld [vmem:[%s674_s5 + $0x10] sm:$0xff]  }
  0x21   :  { %v369_v17 = vld [vmem:[%s671_s2] ss:$0 sm:$0xff]  ;;  %v484_v28 = vld [vmem:[%s674_s5 + $0x8] sm:$0xff]  }
  0x22   :  { %416 = vmatpush3.bf16.msra.mxu0 %v468_v2  ;;  %424 = vmatpush3.bf16.msra.mxu1 %v471_v5  ;;  %v485_v29 = vld [vmem:[%s674_s5] sm:$0xff]  }
  0x23   :  { %441 = vmatprep.subr.bf16.mxu0 %v534_v0  ;;  %425 = vmatprep.subr.bf16.mxu1 %v534_v0  ;;  %v374_v30 = vld [vmem:[%s673_s4] ss:$0 sm:$0xff] }
  0x24   :  { %v383_v40 = vld [vmem:[%s675_s6] ss:$0 sm:$0xff] }
  0x25   :  { %418 = vmatmul.mubr.msk.bf16.vlgmr.msra.gmra.mxu0 %vm85_vm1, %v469_v4 }
  0x26   :  { %457 = vmatprep.mubr.msk.bf16.mxu0 %vm535_vm0, %v534_v0  ;;  %426 = vmatpush3.bf16.msra.mxu1 %v472_v6 }
  0x27   :  { %427 = vmatprep.subr.bf16.mxu1 %v534_v0  ;;  %442 = vmatpush3.bf16.msra.mxu0 %v478_v12 }
  0x28   :  { %443 = vmatprep.subr.bf16.mxu0 %v534_v0 }
  0x2a   :  { %428 = vmatpush3.bf16.msra.mxu1 %v473_v7 }
  0x2b   :  { %429 = vmatprep.subr.bf16.mxu1 %v534_v0  ;;  %444 = vmatpush3.bf16.msra.mxu0 %v479_v13 }
  0x2c   :  { %445 = vmatprep.subr.bf16.mxu0 %v534_v0 }
  0x2e   :  { %430 = vmatpush3.bf16.msra.mxu1 %v474_v8 }
  0x2f   :  { %431 = vmatprep.subr.bf16.mxu1 %v534_v0  ;;  %446 = vmatpush3.bf16.msra.mxu0 %v480_v14 }
  0x30   :  { %447 = vmatprep.subr.bf16.mxu0 %v534_v0 }
  0x32   :  { %432 = vmatpush3.bf16.msra.mxu1 %v475_v9 }
  0x33   :  { %433 = vmatprep.subr.bf16.mxu1 %v534_v0  ;;  %448 = vmatpush3.bf16.msra.mxu0 %v481_v15 }
  0x34   :  { %449 = vmatprep.subr.bf16.mxu0 %v534_v0 }
  0x36   :  { %434 = vmatpush3.bf16.msra.mxu1 %v476_v10 }
  0x37   :  { %435 = vmatprep.subr.bf16.mxu1 %v534_v0  ;;  %450 = vmatpush3.bf16.msra.mxu0 %v482_v16 }
  0x38   :  { %451 = vmatprep.subr.bf16.mxu0 %v534_v0 }
  0x3a   :  { %436 = vmatpush3.bf16.msra.mxu1 %v477_v11 }
  0x3b   :  { %452 = vmatpush3.bf16.msra.mxu0 %v483_v27 }
  0x3c   :  { %453 = vmatprep.subr.bf16.mxu0 %v534_v0 }
  0x3f   :  { %454 = vmatpush3.bf16.msra.mxu0 %v484_v28 }
  0x40   :  { %455 = vmatprep.subr.bf16.mxu0 %v534_v0 }
  0x43   :  { %456 = vmatpush3.bf16.msra.mxu0 %v485_v29 }
  0xe5   :  { %v123_v18 = vpop.f32.mrf.mxu0 }
  0xe6   :  { %v124_v20 = vadd.f32 %v369_v17, %v123_v18 }
  0xe7   :  { %v419_v19 = vpop.f32.mrf.mxu0 }
  0xe8   :  { %v130_v24 = vmax.f32 %v124_v20, 0.0 }
  0xe9   :  { %v126_v21 = vpop.f32.mrf.mxu0 }
  0xea   :  { %v127_v22 = vadd.f32 %v369_v17, %v126_v21 }
  0xeb   :  { %v420_v23 = vpop.f32.mrf.mxu0 }
  0xec   :  { %v131_v25 = vmax.f32 %v127_v22, 0.0 }
  0xee   :  { %v132_v26 = vpack.c.bf16 %v131_v25, %v130_v24 }
  0xf0   :  { %438 = vmatmul.mubr.bf16.vlgmr.msra.gmra.mxu1 %v132_v26 }
 0x1b0   :  { %v238_v31 = vpop.f32.mrf.mxu1 }
 0x1b1   :  { %v239_v33 = vadd.f32 %v374_v30, %v238_v31 }
 0x1b2   :  { %v439_v32 = vpop.f32.mrf.mxu1 }
 0x1b3   :  { %v245_v37 = vmax.f32 %v239_v33, 0.0 }
 0x1b4   :  { %v241_v34 = vpop.f32.mrf.mxu1 }
 0x1b5   :  { %v242_v35 = vadd.f32 %v374_v30, %v241_v34 }
 0x1b6   :  { %v440_v36 = vpop.f32.mrf.mxu1 }
 0x1b7   :  { %v246_v38 = vmax.f32 %v242_v35, 0.0 }
 0x1b9   :  { %v247_v39 = vpack.c.bf16 %v246_v38, %v245_v37 }
 0x1bb   :  { %458 = vmatmul.mubr.bf16.vlgmr.msra.gmra.mxu0 %v247_v39 }
 0x27b   :  { %v353_v41 = vpop.f32.mrf.mxu0 }
 0x27c   :  { %v354_v42 = vadd.f32 %v383_v40, %v353_v41 }
 0x27d   :  { %v459_v43 = vpop.f32.mrf.mxu0 }
 0x27e   :  { %361 = vst.msk [vmem:[%s676_s7] sm:$0xff] %vm360_vm2, %v354_v42 }
 0x27f   :  { %v356_v44 = vpop.f32.mrf.mxu0 }
 0x280   :  { %v357_v45 = vadd.f32 %v383_v40, %v356_v44 }
 0x281   :  { %v460_v46 = vpop.f32.mrf.mxu0 }
 0x282   :  { %362 = vst.msk [vmem:[%s676_s7 + $0x8] sm:$0xff] %vm360_vm2, %v357_v45 }
 0x283   :  { %367 = vsyncpa [#allocation3], 1 }
 0x284   :  { %368 = vsyncpa [#allocation5], 1 }

// kernel: tpu_custom_call.1
= control target key start
LH: loop header
LB: loop body
LE: loop exit
PB: predicated region body
PF: predicated region fallthrough
CT: control target
= control target key end

     0   :  { %12 = vsyncpa [#allocation3], 0  ;;  %s669_s0 = inlined_call_operand.hbm [shape: bf16[16,32], index: 0, kind: input, shape index: {}]   ;;  %s670_s1 = inlined_call_operand.hbm [shape: bf16[32,128], index: 1, kind: input, shape index: {}]   ;;  %s671_s2 = inlined_call_operand.vmem [shape: f32[1,128], index: 2, kind: input, shape index: {}]   ;;  %s672_s3 = inlined_call_operand.vmem [shape: bf16[128,128], index: 3, kind: input, shape index: {}]   ;;  %s673_s4 = inlined_call_operand.vmem [shape: f32[1,128], index: 4, kind: input, shape index: {}]   ;;  %s674_s5 = inlined_call_operand.vmem [shape: bf16[128,4], index: 5, kind: input, shape index: {}]   ;;  %s675_s6 = inlined_call_operand.vmem [shape: f32[1,4], index: 6, kind: input, shape index: {}]   ;;  %s676_s7 = inlined_call_operand.vmem [shape: f32[16,4], index: 7, kind: output, shape index: {}]  }
   0x1   :  { %13 = vsyncpa [#allocation5], 0  ;;  %s530_s24 = smov [#allocation2]  }
   0x2   :  { %s19_s25 = sshll.u32 %s530_s24, 4  ;;  %s20_s25 = int_to_ptr.vmem [resolvable:$true] %s19_s25 }
   0x3   :  { %s494_s26 = scalar_lea.vmem %s20_s25, 128  ;;  %p499_p1 = scmp.lt.s32.totalorder %s20_s25, %s20_s25 }
   0x4   :  { %p495_p0 = scmp.ne.s32.totalorder %s20_s25, %s494_s26  ;;  %p500_p2 = scmp.lt.s32.totalorder %s494_s26, %s494_s26 }
   0x6   :  { %p501_p3 = por %p500_p2, %p499_p1 }
   0x8   :  { %p502_p4 = pnand %p501_p3, %p495_p0 }
   0xa   :  { %505 = shalt.err (!%p502_p4)
}
   0xb   :  { %s531_s27 = smov 64   ;;  %s532_s28 = smov 4  }
   0xc   :  { %25 = dma.hbm_to_vmem [thread:$0]  %s669_s0, 128, %s20_s25, [#allocation3], %s531_s27, %s531_s27, %s532_s28  }
   0xd   :  { %s533_s8 = smov [#allocation4]  }
   0xe   :  { %s31_s9 = sshll.u32 %s533_s8, 4  ;;  %s32_s9 = int_to_ptr.vmem [resolvable:$true] %s31_s9 }
   0xf   :  { %s514_s10 = scalar_lea.vmem %s32_s9, 256  ;;  %p519_p6 = scmp.lt.s32.totalorder %s32_s9, %s32_s9 }
  0x10   :  { %p515_p5 = scmp.ne.s32.totalorder %s32_s9, %s514_s10  ;;  %p520_p7 = scmp.lt.s32.totalorder %s514_s10, %s514_s10 }
  0x12   :  { %p521_p8 = por %p520_p7, %p519_p6 }
  0x14   :  { %p522_p9 = pnand %p521_p8, %p515_p5 }
  0x16   :  { %525 = shalt.err (!%p522_p9)
}
  0x17   :  { %37 = dma.hbm_to_vmem [thread:$0]  %s670_s1, 256, %s32_s9, [#allocation5], %s531_s27, %s531_s27, %s532_s28  }
  0x18   :  { %526 = dma.done.wait [#allocation3], 128  }
  0x19   :  { %527 = vsyncadd [#allocation3], 4294967168 }
  0x1a   :  { %528 = dma.done.wait [#allocation5], 256  }
  0x1b   :  { %529 = vsyncadd [#allocation5], 4294967040  ;;  %v534_v0 = vmov 0.0   ;;  %vm535_vm0 = vmmov 0   ;;  %v467_v1 = vld [vmem:[#allocation4 + $0x8] sm:$0xff]   ;;  %v468_v2 = vld [vmem:[#allocation4] sm:$0xff]  }
  0x1c   :  { %413 = vmatprep.subr.bf16.mxu0 %v534_v0  ;;  %417 = vmatprep.mubr.msk.bf16.mxu0 %vm535_vm0, %v534_v0  ;;  %v470_v3 = vld [vmem:[%s672_s3 + $0x38] sm:$0xff]   ;;  %v469_v4 = vld [vmem:[#allocation2] sm:$0xff]   ;;  %v471_v5 = vld [vmem:[%s672_s3 + $0x30] sm:$0xff]   ;;  %vm85_vm1 = vcmask 261120   ;;  %vm360_vm2 = vcmask 31744  }
  0x1d   :  { %421 = vmatprep.subr.bf16.mxu1 %v534_v0  ;;  %437 = vmatprep.mubr.msk.bf16.mxu1 %vm535_vm0, %v534_v0  ;;  %v472_v6 = vld [vmem:[%s672_s3 + $0x28] sm:$0xff]   ;;  %v473_v7 = vld [vmem:[%s672_s3 + $0x20] sm:$0xff]   ;;  %v474_v8 = vld [vmem:[%s672_s3 + $0x18] sm:$0xff]  }
  0x1e   :  { %414 = vmatpush3.bf16.msra.mxu0 %v467_v1  ;;  %422 = vmatpush3.bf16.msra.mxu1 %v470_v3  ;;  %v475_v9 = vld [vmem:[%s672_s3 + $0x10] sm:$0xff]   ;;  %v476_v10 = vld [vmem:[%s672_s3 + $0x8] sm:$0xff]   ;;  %v477_v11 = vld [vmem:[%s672_s3] sm:$0xff]  }
  0x1f   :  { %415 = vmatprep.subr.bf16.mxu0 %v534_v0  ;;  %423 = vmatprep.subr.bf16.mxu1 %v534_v0  ;;  %v478_v12 = vld [vmem:[%s674_s5 + $0x38] sm:$0xff]   ;;  %v479_v13 = vld [vmem:[%s674_s5 + $0x30] sm:$0xff]   ;;  %v480_v14 = vld [vmem:[%s674_s5 + $0x28] sm:$0xff]  }
  0x20   :  { %v481_v15 = vld [vmem:[%s674_s5 + $0x20] sm:$0xff]   ;;  %v482_v16 = vld [vmem:[%s674_s5 + $0x18] sm:$0xff]   ;;  %v483_v27 = vld [vmem:[%s674_s5 + $0x10] sm:$0xff]  }
  0x21   :  { %v369_v17 = vld [vmem:[%s671_s2] ss:$0 sm:$0xff]  ;;  %v484_v28 = vld [vmem:[%s674_s5 + $0x8] sm:$0xff]  }
  0x22   :  { %416 = vmatpush3.bf16.msra.mxu0 %v468_v2  ;;  %424 = vmatpush3.bf16.msra.mxu1 %v471_v5  ;;  %v485_v29 = vld [vmem:[%s674_s5] sm:$0xff]  }
  0x23   :  { %441 = vmatprep.subr.bf16.mxu0 %v534_v0  ;;  %425 = vmatprep.subr.bf16.mxu1 %v534_v0  ;;  %v374_v30 = vld [vmem:[%s673_s4] ss:$0 sm:$0xff] }
  0x24   :  { %v383_v40 = vld [vmem:[%s675_s6] ss:$0 sm:$0xff] }
  0x25   :  { %418 = vmatmul.mubr.msk.bf16.vlgmr.msra.gmra.mxu0 %vm85_vm1, %v469_v4 }
  0x26   :  { %457 = vmatprep.mubr.msk.bf16.mxu0 %vm535_vm0, %v534_v0  ;;  %426 = vmatpush3.bf16.msra.mxu1 %v472_v6 }
  0x27   :  { %427 = vmatprep.subr.bf16.mxu1 %v534_v0  ;;  %442 = vmatpush3.bf16.msra.mxu0 %v478_v12 }
  0x28   :  { %443 = vmatprep.subr.bf16.mxu0 %v534_v0 }
  0x2a   :  { %428 = vmatpush3.bf16.msra.mxu1 %v473_v7 }
  0x2b   :  { %429 = vmatprep.subr.bf16.mxu1 %v534_v0  ;;  %444 = vmatpush3.bf16.msra.mxu0 %v479_v13 }
  0x2c   :  { %445 = vmatprep.subr.bf16.mxu0 %v534_v0 }
  0x2e   :  { %430 = vmatpush3.bf16.msra.mxu1 %v474_v8 }
  0x2f   :  { %431 = vmatprep.subr.bf16.mxu1 %v534_v0  ;;  %446 = vmatpush3.bf16.msra.mxu0 %v480_v14 }
  0x30   :  { %447 = vmatprep.subr.bf16.mxu0 %v534_v0 }
  0x32   :  { %432 = vmatpush3.bf16.msra.mxu1 %v475_v9 }
  0x33   :  { %433 = vmatprep.subr.bf16.mxu1 %v534_v0  ;;  %448 = vmatpush3.bf16.msra.mxu0 %v481_v15 }
  0x34   :  { %449 = vmatprep.subr.bf16.mxu0 %v534_v0 }
  0x36   :  { %434 = vmatpush3.bf16.msra.mxu1 %v476_v10 }
  0x37   :  { %435 = vmatprep.subr.bf16.mxu1 %v534_v0  ;;  %450 = vmatpush3.bf16.msra.mxu0 %v482_v16 }
  0x38   :  { %451 = vmatprep.subr.bf16.mxu0 %v534_v0 }
  0x3a   :  { %436 = vmatpush3.bf16.msra.mxu1 %v477_v11 }
  0x3b   :  { %452 = vmatpush3.bf16.msra.mxu0 %v483_v27 }
  0x3c   :  { %453 = vmatprep.subr.bf16.mxu0 %v534_v0 }
  0x3f   :  { %454 = vmatpush3.bf16.msra.mxu0 %v484_v28 }
  0x40   :  { %455 = vmatprep.subr.bf16.mxu0 %v534_v0 }
  0x43   :  { %456 = vmatpush3.bf16.msra.mxu0 %v485_v29 }
  0xe5   :  { %v123_v18 = vpop.f32.mrf.mxu0 }
  0xe6   :  { %v124_v20 = vadd.f32 %v369_v17, %v123_v18 }
  0xe7   :  { %v419_v19 = vpop.f32.mrf.mxu0 }
  0xe8   :  { %v130_v24 = vmax.f32 %v124_v20, 0.0 }
  0xe9   :  { %v126_v21 = vpop.f32.mrf.mxu0 }
  0xea   :  { %v127_v22 = vadd.f32 %v369_v17, %v126_v21 }
  0xeb   :  { %v420_v23 = vpop.f32.mrf.mxu0 }
  0xec   :  { %v131_v25 = vmax.f32 %v127_v22, 0.0 }
  0xee   :  { %v132_v26 = vpack.c.bf16 %v131_v25, %v130_v24 }
  0xf0   :  { %438 = vmatmul.mubr.bf16.vlgmr.msra.gmra.mxu1 %v132_v26 }
 0x1b0   :  { %v238_v31 = vpop.f32.mrf.mxu1 }
 0x1b1   :  { %v239_v33 = vadd.f32 %v374_v30, %v238_v31 }
 0x1b2   :  { %v439_v32 = vpop.f32.mrf.mxu1 }
 0x1b3   :  { %v245_v37 = vmax.f32 %v239_v33, 0.0 }
 0x1b4   :  { %v241_v34 = vpop.f32.mrf.mxu1 }
 0x1b5   :  { %v242_v35 = vadd.f32 %v374_v30, %v241_v34 }
 0x1b6   :  { %v440_v36 = vpop.f32.mrf.mxu1 }
 0x1b7   :  { %v246_v38 = vmax.f32 %v242_v35, 0.0 }
 0x1b9   :  { %v247_v39 = vpack.c.bf16 %v246_v38, %v245_v37 }
 0x1bb   :  { %458 = vmatmul.mubr.bf16.vlgmr.msra.gmra.mxu0 %v247_v39 }
 0x27b   :  { %v353_v41 = vpop.f32.mrf.mxu0 }
 0x27c   :  { %v354_v42 = vadd.f32 %v383_v40, %v353_v41 }
 0x27d   :  { %v459_v43 = vpop.f32.mrf.mxu0 }
 0x27e   :  { %361 = vst.msk [vmem:[%s676_s7] sm:$0xff] %vm360_vm2, %v354_v42 }
 0x27f   :  { %v356_v44 = vpop.f32.mrf.mxu0 }
 0x280   :  { %v357_v45 = vadd.f32 %v383_v40, %v356_v44 }
 0x281   :  { %v460_v46 = vpop.f32.mrf.mxu0 }
 0x282   :  { %362 = vst.msk [vmem:[%s676_s7 + $0x8] sm:$0xff] %vm360_vm2, %v357_v45 }
 0x283   :  { %367 = vsyncpa [#allocation3], 1 }
 0x284   :  { %368 = vsyncpa [#allocation5], 1 }

</bundles_post_ra>
